<compile_context>
chip_gen: v7x
topology: tpu7x:2x2x1
jax: 0.10.0
libtpu: 0.0.40
codegen_flags: <defaults>
</compile_context>

<pallas_src>
import jax
import jax.numpy as jnp
from jax.experimental import pallas as pl
from jax.experimental.pallas import tpu as pltpu

# Small self-consistent config (torch module uses n_embd=768, block_size=142;
# scaled down per instructions).
N_EMBD = 32
BLOCK_SIZE = 16
NUM_HEADS = 4
HEAD_SIZE = N_EMBD // NUM_HEADS  # 8, even (required by Head)


# ----------------------------- kernel ---------------------------------------


def _mha_fused_kernel(x_ref, w3_ref, wp3_ref, tab_ref, mask_ref, bp_ref, o_ref):
    """Fused multi-head attention for one batch element per grid step."""
    H = w3_ref.shape[0]
    hs = tab_ref.shape[-1]
    T = x_ref.shape[1]
    C = x_ref.shape[2]

    x2 = x_ref[0]                                    # (T, C)
    xh = jnp.broadcast_to(x2, (H, T, C))             # (H, T, C)

    # Per-head projection [key | rot_half(key) | value] as one batched matmul.
    kkv = jax.lax.dot_general(
        xh, w3_ref[...], (((2,), (1,)), ((0,), (0,))),
        preferred_element_type=jnp.float32)          # (H, T, 3*hs)
    kp = kkv[..., :hs]                               # key(x)
    kr = kkv[..., hs:2 * hs]                         # rot_half(key(x))
    v3 = kkv[..., 2 * hs:]                           # value(x)

    # RoPE: k = rot_theta(key(x));  q = rot(rot(k)) == rot_{2*theta}(key(x)).
    # tab rows: [cos(t), sin(t), scale*cos(2t), scale*sin(2t)], each (T, hs).
    k3 = kp * tab_ref[0] + kr * tab_ref[1]           # (H, T, hs)
    q3 = kp * tab_ref[2] + kr * tab_ref[3]           # softmax scale folded in

    # Scores for all heads at once: (H, T, T).
    s = jax.lax.dot_general(q3, k3, (((2,), (2,)), ((0,), (0,))),
                            preferred_element_type=jnp.float32)
    s = s + mask_ref[...]                            # causal -inf (+ attn_mask)

    # One softmax pass over all heads (EUP reciprocal for the denominator).
    s = s - jnp.max(s, axis=-1, keepdims=True)
    p = jnp.exp(s)
    probs = p * pl.reciprocal(jnp.sum(p, axis=-1, keepdims=True), approx=True)

    # Context: (H, T, hs).
    ctx = jax.lax.dot_general(probs, v3, (((2,), (1,)), ((0,), (0,))),
                              preferred_element_type=jnp.float32)

    # torch.cat over heads + proj  ==  sum_h ctx_h @ Wp[h*hs:(h+1)*hs, :].
    yh = jax.lax.dot_general(ctx, wp3_ref[...], (((2,), (1,)), ((0,), (0,))),
                             preferred_element_type=jnp.float32)   # (H, T, C)
    o_ref[0] = jnp.sum(yh, axis=0) + bp_ref[...]


# ----------------------------- wrapper --------------------------------------


def multi_head_attention(x, params, attn_mask=None):
    B, T, C = x.shape
    H, _, hs = params["wk"].shape
    scale = float(C) ** -0.5

    # --- trace-time weight fusion --------------------------------------------
    wk = params["wk"]                                 # (H, C, hs)
    wv = params["wv"]
    # Fold rot_half into the key weights: rot_half(x @ Wk) == x @ Wk_rot with
    #   Wk_rot[:, 2m] = -Wk[:, 2m+1],  Wk_rot[:, 2m+1] = Wk[:, 2m].
    wkp = wk.reshape(H, C, hs // 2, 2)
    wk_rot = jnp.stack([-wkp[..., 1], wkp[..., 0]], axis=-1).reshape(H, C, hs)
    w3 = jnp.concatenate([wk, wk_rot, wv], axis=-1)   # (H, C, 3*hs)
    wp3 = params["w_proj_t"].reshape(H, hs, C)        # (H, hs, C)
    bp = params["b_proj"].reshape(1, C)

    # --- RoPE tables (same construction as the torch buffers), sliced to T ---
    theta = 1.0 / (10000.0 ** (jnp.arange(0, hs, 2, dtype=jnp.float32) / hs))
    pos = jnp.arange(T, dtype=jnp.float32)
    freqs = jnp.repeat(pos[:, None] * theta[None, :], 2, axis=-1)   # (T, hs)
    tab = jnp.stack([jnp.cos(freqs), jnp.sin(freqs),
                     scale * jnp.cos(2.0 * freqs),
                     scale * jnp.sin(2.0 * freqs)], axis=0)         # (4, T, hs)

    # --- combined causal + additive mask --------------------------------------
    row = jnp.arange(T, dtype=jnp.int32)[:, None]
    col = jnp.arange(T, dtype=jnp.int32)[None, :]
    if attn_mask is None:
        base = jnp.zeros((T, T), jnp.float32)
    else:
        base = attn_mask.astype(jnp.float32).reshape(T, T)
    mask = jnp.where(col <= row, base, -jnp.inf)                    # (T, T)

    grid_spec = pltpu.PrefetchScalarGridSpec(
        num_scalar_prefetch=0,
        grid=(B,),
        in_specs=[
            pl.BlockSpec((1, T, C), lambda b: (b, 0, 0)),
            pl.BlockSpec((H, C, 3 * hs), lambda b: (0, 0, 0)),
            pl.BlockSpec((H, hs, C), lambda b: (0, 0, 0)),
            pl.BlockSpec((4, T, hs), lambda b: (0, 0, 0)),
            pl.BlockSpec((T, T), lambda b: (0, 0)),
            pl.BlockSpec((1, C), lambda b: (0, 0)),
        ],
        out_specs=pl.BlockSpec((1, T, C), lambda b: (b, 0, 0)),
    )

    return pl.pallas_call(
        _mha_fused_kernel,
        out_shape=jax.ShapeDtypeStruct((B, T, C), jnp.float32),
        grid_spec=grid_spec,
        compiler_params=pltpu.CompilerParams(
            dimension_semantics=("parallel",)),
    )(x, w3, wp3, tab, mask, bp)


# --------------------------- params & reference ------------------------------


def init_params(key):
    ks = jax.random.split(key, 5)
    bound = 1.0 / (N_EMBD ** 0.5)
    shape_h = (NUM_HEADS, N_EMBD, HEAD_SIZE)
    wk = jax.random.uniform(ks[0], shape_h, jnp.float32, -bound, bound)
    # wq exists in the module but is unused by the reference forward (q = rot(k)).
    wq = jax.random.uniform(ks[1], shape_h, jnp.float32, -bound, bound)
    wv = jax.random.uniform(ks[2], shape_h, jnp.float32, -bound, bound)
    w_proj = jax.random.uniform(ks[3], (N_EMBD, N_EMBD), jnp.float32, -bound, bound)
    b_proj = jax.random.uniform(ks[4], (N_EMBD,), jnp.float32, -bound, bound)
    return dict(wk=wk, wq=wq, wv=wv, w_proj_t=w_proj.T, b_proj=b_proj)


def reference(x, params, attn_mask=None):
    """Pure-JAX mirror of the PyTorch forward (for correctness check)."""
    B, T, C = x.shape
    hs = HEAD_SIZE
    theta = 1.0 / (10000.0 ** (jnp.arange(0, hs, 2, dtype=jnp.float32) / hs))
    pos = jnp.arange(BLOCK_SIZE, dtype=jnp.float32)
    freqs = jnp.repeat(pos[:, None] * theta[None, :], 2, axis=-1)[:T]

    def rot_half(z):
        lead = z.shape[:-1]
        zz = z.reshape(*lead, hs // 2, 2)
        return jnp.stack([-zz[..., 1], zz[..., 0]], axis=-1).reshape(*lead, hs)

    def rot(z):
        return z * jnp.cos(freqs) + rot_half(z) * jnp.sin(freqs)

    tril = jnp.tril(jnp.ones((T, T), jnp.float32))
    outs = []
    for h in range(NUM_HEADS):
        k = x @ params["wk"][h]
        k = rot(k)
        q = rot(k)
        wei = (q @ jnp.swapaxes(k, -1, -2)) * (C ** -0.5)
        wei = jnp.where(tril == 0, -jnp.inf, wei)
        if attn_mask is not None:
            wei = wei + attn_mask
        wei = jax.nn.softmax(wei, axis=-1)
        v = x @ params["wv"][h]
        outs.append(wei @ v)
    out = jnp.concatenate(outs, axis=-1)
    return out @ params["w_proj_t"] + params["b_proj"]


# --------------------------------- main --------------------------------------

if __name__ == "__main__":
    key = jax.random.PRNGKey(0)
    kx, kp, km = jax.random.split(key, 3)
    B, T = 2, 8
    x = jax.random.normal(kx, (B, T, N_EMBD), jnp.float32)
    params = init_params(kp)

    # no attention mask
    out = jax.block_until_ready(multi_head_attention(x, params, attn_mask=None))
    assert out.shape == (B, T, N_EMBD)
    ref = reference(x, params, attn_mask=None)
    max_err = float(jnp.max(jnp.abs(out - ref)))
    assert jnp.allclose(out, ref, atol=2e-2, rtol=2e-2), f"max_err={max_err}"

    # with a finite additive attention mask
    mask = 0.1 * jax.random.normal(km, (T, T), jnp.float32)
    out_m = jax.block_until_ready(multi_head_attention(x, params, attn_mask=mask))
    ref_m = reference(x, params, attn_mask=mask)
    max_err_m = float(jnp.max(jnp.abs(out_m - ref_m)))
    assert jnp.allclose(out_m, ref_m, atol=2e-2, rtol=2e-2), f"max_err={max_err_m}"

    print("KERNEL_OK")
</pallas_src>

<mosaic_0001>
module attributes {stable_mosaic.version = 11 : i64} {
  func.func @_mha_fused_kernel(%arg0: i32, %arg1: memref<1x8x32xf32, #tpu.memory_space<vmem>>, %arg2: memref<4x32x24xf32, #tpu.memory_space<vmem>>, %arg3: memref<4x8x32xf32, #tpu.memory_space<vmem>>, %arg4: memref<4x8x8xf32, #tpu.memory_space<vmem>>, %arg5: memref<8x8xf32, #tpu.memory_space<vmem>>, %arg6: memref<1x32xf32, #tpu.memory_space<vmem>>, %arg7: memref<1x8x32xf32, #tpu.memory_space<vmem>>) attributes {dimension_semantics = [#tpu.dimension_semantics<parallel>], iteration_bounds = array<i64: 2>, scalar_prefetch = 0 : i64, scratch_operands = 0 : i64, tpu.core_type = #tpu.core_type<tc>, window_params = [{transform_indices = @transform_0, window_bounds = array<i64: 1, 8, 32>}, {pipeline_mode = #tpu.pipeline_mode<synchronous>, transform_indices = @transform_1, window_bounds = array<i64: 4, 32, 24>}, {pipeline_mode = #tpu.pipeline_mode<synchronous>, transform_indices = @transform_2, window_bounds = array<i64: 4, 8, 32>}, {pipeline_mode = #tpu.pipeline_mode<synchronous>, transform_indices = @transform_3, window_bounds = array<i64: 4, 8, 8>}, {pipeline_mode = #tpu.pipeline_mode<synchronous>, transform_indices = @transform_4, window_bounds = array<i64: 8, 8>}, {pipeline_mode = #tpu.pipeline_mode<synchronous>, transform_indices = @transform_5, window_bounds = array<i64: 1, 32>}, {transform_indices = @transform_6, window_bounds = array<i64: 1, 8, 32>}]} {
    %c0 = arith.constant 0 : index
    %c0_0 = arith.constant 0 : index
    %c0_1 = arith.constant 0 : index
    %0 = vector.load %arg1[%c0, %c0_0, %c0_1] : memref<1x8x32xf32, #tpu.memory_space<vmem>>, vector<1x8x32xf32>
    %1 = vector.shape_cast %0 : vector<1x8x32xf32> to vector<8x32xf32>
    %2 = vector.shape_cast %1 : vector<8x32xf32> to vector<1x8x32xf32>
    %3 = vector.broadcast %2 : vector<1x8x32xf32> to vector<4x8x32xf32>
    %c0_2 = arith.constant 0 : index
    %c0_3 = arith.constant 0 : index
    %c0_4 = arith.constant 0 : index
    %4 = vector.load %arg2[%c0_2, %c0_3, %c0_4] : memref<4x32x24xf32, #tpu.memory_space<vmem>>, vector<4x32x24xf32>
    %cst = arith.constant dense<0.000000e+00> : vector<4x8x24xf32>
    %5 = tpu.matmul %3, %4, %cst {dimension_numbers = #tpu.dot_dimension_numbers<[2], [1], [1], [2], [0, 0, 0, 1, 1, 2], [0], [0]>} : vector<4x8x32xf32>, vector<4x32x24xf32>, vector<4x8x24xf32> -> vector<4x8x24xf32>
    %6 = vector.extract_strided_slice %5 {offsets = [0, 0, 0], sizes = [4, 8, 8], strides = [1, 1, 1]} : vector<4x8x24xf32> to vector<4x8x8xf32>
    %7 = vector.extract_strided_slice %5 {offsets = [0, 0, 8], sizes = [4, 8, 8], strides = [1, 1, 1]} : vector<4x8x24xf32> to vector<4x8x8xf32>
    %8 = vector.extract_strided_slice %5 {offsets = [0, 0, 16], sizes = [4, 8, 8], strides = [1, 1, 1]} : vector<4x8x24xf32> to vector<4x8x8xf32>
    %c0_5 = arith.constant 0 : index
    %c0_6 = arith.constant 0 : index
    %c0_7 = arith.constant 0 : index
    %9 = vector.load %arg4[%c0_5, %c0_6, %c0_7] : memref<4x8x8xf32, #tpu.memory_space<vmem>>, vector<1x8x8xf32>
    %10 = vector.shape_cast %9 : vector<1x8x8xf32> to vector<8x8xf32>
    %11 = vector.shape_cast %10 : vector<8x8xf32> to vector<1x8x8xf32>
    %12 = vector.broadcast %11 : vector<1x8x8xf32> to vector<4x8x8xf32>
    %13 = arith.mulf %6, %12 : vector<4x8x8xf32>
    %c1 = arith.constant 1 : index
    %c0_8 = arith.constant 0 : index
    %c0_9 = arith.constant 0 : index
    %14 = vector.load %arg4[%c1, %c0_8, %c0_9] : memref<4x8x8xf32, #tpu.memory_space<vmem>>, vector<1x8x8xf32>
    %15 = vector.shape_cast %14 : vector<1x8x8xf32> to vector<8x8xf32>
    %16 = vector.shape_cast %15 : vector<8x8xf32> to vector<1x8x8xf32>
    %17 = vector.broadcast %16 : vector<1x8x8xf32> to vector<4x8x8xf32>
    %18 = arith.mulf %7, %17 : vector<4x8x8xf32>
    %19 = arith.addf %13, %18 : vector<4x8x8xf32>
    %c2 = arith.constant 2 : index
    %c0_10 = arith.constant 0 : index
    %c0_11 = arith.constant 0 : index
    %20 = vector.load %arg4[%c2, %c0_10, %c0_11] : memref<4x8x8xf32, #tpu.memory_space<vmem>>, vector<1x8x8xf32>
    %21 = vector.shape_cast %20 : vector<1x8x8xf32> to vector<8x8xf32>
    %22 = vector.shape_cast %21 : vector<8x8xf32> to vector<1x8x8xf32>
    %23 = vector.broadcast %22 : vector<1x8x8xf32> to vector<4x8x8xf32>
    %24 = arith.mulf %6, %23 : vector<4x8x8xf32>
    %c3 = arith.constant 3 : index
    %c0_12 = arith.constant 0 : index
    %c0_13 = arith.constant 0 : index
    %25 = vector.load %arg4[%c3, %c0_12, %c0_13] : memref<4x8x8xf32, #tpu.memory_space<vmem>>, vector<1x8x8xf32>
    %26 = vector.shape_cast %25 : vector<1x8x8xf32> to vector<8x8xf32>
    %27 = vector.shape_cast %26 : vector<8x8xf32> to vector<1x8x8xf32>
    %28 = vector.broadcast %27 : vector<1x8x8xf32> to vector<4x8x8xf32>
    %29 = arith.mulf %7, %28 : vector<4x8x8xf32>
    %30 = arith.addf %24, %29 : vector<4x8x8xf32>
    %cst_14 = arith.constant dense<0.000000e+00> : vector<4x8x8xf32>
    %31 = tpu.matmul %30, %19, %cst_14 {dimension_numbers = #tpu.dot_dimension_numbers<[2], [2], [1], [1], [0, 0, 0, 1, 1, 1], [0], [0]>} : vector<4x8x8xf32>, vector<4x8x8xf32>, vector<4x8x8xf32> -> vector<4x8x8xf32>
    %c0_15 = arith.constant 0 : index
    %c0_16 = arith.constant 0 : index
    %32 = vector.load %arg5[%c0_15, %c0_16] : memref<8x8xf32, #tpu.memory_space<vmem>>, vector<8x8xf32>
    %33 = vector.shape_cast %32 : vector<8x8xf32> to vector<1x8x8xf32>
    %34 = vector.broadcast %33 : vector<1x8x8xf32> to vector<4x8x8xf32>
    %35 = arith.addf %31, %34 : vector<4x8x8xf32>
    %cst_17 = arith.constant dense<0xFF800000> : vector<4x8xf32>
    %36 = vector.multi_reduction <maximumf>, %35, %cst_17 [2] : vector<4x8x8xf32> to vector<4x8xf32>
    %37 = vector.shape_cast %36 : vector<4x8xf32> to vector<4x8x1xf32>
    %38 = vector.broadcast %37 : vector<4x8x1xf32> to vector<4x8x8xf32>
    %39 = arith.subf %35, %38 : vector<4x8x8xf32>
    %40 = math.exp %39 : vector<4x8x8xf32>
    %cst_18 = arith.constant dense<0.000000e+00> : vector<4x8xf32>
    %41 = vector.multi_reduction <add>, %40, %cst_18 [2] : vector<4x8x8xf32> to vector<4x8xf32>
    %42 = vector.shape_cast %41 : vector<4x8xf32> to vector<4x8x1xf32>
    %43 = tpu.reciprocal %42 {approx = true} : vector<4x8x1xf32> -> vector<4x8x1xf32>
    %44 = vector.broadcast %43 : vector<4x8x1xf32> to vector<4x8x8xf32>
    %45 = arith.mulf %40, %44 : vector<4x8x8xf32>
    %cst_19 = arith.constant dense<0.000000e+00> : vector<4x8x8xf32>
    %46 = tpu.matmul %45, %8, %cst_19 {dimension_numbers = #tpu.dot_dimension_numbers<[2], [1], [1], [2], [0, 0, 0, 1, 1, 2], [0], [0]>} : vector<4x8x8xf32>, vector<4x8x8xf32>, vector<4x8x8xf32> -> vector<4x8x8xf32>
    %c0_20 = arith.constant 0 : index
    %c0_21 = arith.constant 0 : index
    %c0_22 = arith.constant 0 : index
    %47 = vector.load %arg3[%c0_20, %c0_21, %c0_22] : memref<4x8x32xf32, #tpu.memory_space<vmem>>, vector<4x8x32xf32>
    %cst_23 = arith.constant dense<0.000000e+00> : vector<4x8x32xf32>
    %48 = tpu.matmul %46, %47, %cst_23 {dimension_numbers = #tpu.dot_dimension_numbers<[2], [1], [1], [2], [0, 0, 0, 1, 1, 2], [0], [0]>} : vector<4x8x8xf32>, vector<4x8x32xf32>, vector<4x8x32xf32> -> vector<4x8x32xf32>
    %cst_24 = arith.constant dense<0.000000e+00> : vector<8x32xf32>
    %49 = vector.multi_reduction <add>, %48, %cst_24 [0] : vector<4x8x32xf32> to vector<8x32xf32>
    %c0_25 = arith.constant 0 : index
    %c0_26 = arith.constant 0 : index
    %50 = vector.load %arg6[%c0_25, %c0_26] : memref<1x32xf32, #tpu.memory_space<vmem>>, vector<1x32xf32>
    %51 = vector.broadcast %50 : vector<1x32xf32> to vector<8x32xf32>
    %52 = arith.addf %49, %51 : vector<8x32xf32>
    %c0_27 = arith.constant 0 : index
    %c0_28 = arith.constant 0 : index
    %c0_29 = arith.constant 0 : index
    %53 = vector.load %arg7[%c0_27, %c0_28, %c0_29] : memref<1x8x32xf32, #tpu.memory_space<vmem>>, vector<1x8x32xf32>
    %54 = vector.shape_cast %53 : vector<1x8x32xf32> to vector<8x32xf32>
    %55 = vector.shape_cast %52 : vector<8x32xf32> to vector<1x8x32xf32>
    tpu.vector_store %arg7[%c0_27, %c0_28, %c0_29], %55 {strides = array<i32>} : memref<1x8x32xf32, #tpu.memory_space<vmem>>, vector<1x8x32xf32>,
    return
  }
  func.func @transform_0(%arg0: i32) -> (i32, i32, i32) {
    %c0_i32 = arith.constant 0 : i32
    %c0_i32_0 = arith.constant 0 : i32
    %c0_i32_1 = arith.constant 0 : i32
    return %arg0, %c0_i32, %c0_i32_0 : i32, i32, i32
  }
  func.func @transform_1(%arg0: i32) -> (i32, i32, i32) {
    %c0_i32 = arith.constant 0 : i32
    %c0_i32_0 = arith.constant 0 : i32
    %c0_i32_1 = arith.constant 0 : i32
    %c0_i32_2 = arith.constant 0 : i32
    return %c0_i32, %c0_i32_0, %c0_i32_1 : i32, i32, i32
  }
  func.func @transform_2(%arg0: i32) -> (i32, i32, i32) {
    %c0_i32 = arith.constant 0 : i32
    %c0_i32_0 = arith.constant 0 : i32
    %c0_i32_1 = arith.constant 0 : i32
    %c0_i32_2 = arith.constant 0 : i32
    return %c0_i32, %c0_i32_0, %c0_i32_1 : i32, i32, i32
  }
  func.func @transform_3(%arg0: i32) -> (i32, i32, i32) {
    %c0_i32 = arith.constant 0 : i32
    %c0_i32_0 = arith.constant 0 : i32
    %c0_i32_1 = arith.constant 0 : i32
    %c0_i32_2 = arith.constant 0 : i32
    return %c0_i32, %c0_i32_0, %c0_i32_1 : i32, i32, i32
  }
  func.func @transform_4(%arg0: i32) -> (i32, i32) {
    %c0_i32 = arith.constant 0 : i32
    %c0_i32_0 = arith.constant 0 : i32
    %c0_i32_1 = arith.constant 0 : i32
    return %c0_i32, %c0_i32_0 : i32, i32
  }
  func.func @transform_5(%arg0: i32) -> (i32, i32) {
    %c0_i32 = arith.constant 0 : i32
    %c0_i32_0 = arith.constant 0 : i32
    %c0_i32_1 = arith.constant 0 : i32
    return %c0_i32, %c0_i32_0 : i32, i32
  }
  func.func @transform_6(%arg0: i32) -> (i32, i32, i32) {
    %c0_i32 = arith.constant 0 : i32
    %c0_i32_0 = arith.constant 0 : i32
    %c0_i32_1 = arith.constant 0 : i32
    return %arg0, %c0_i32, %c0_i32_0 : i32, i32, i32
  }
}

</mosaic_0001>

<bundles_post_ra>
// kernel: tpu_custom_call.1
= control target key start
LH: loop header
LB: loop body
LE: loop exit
PB: predicated region body
PF: predicated region fallthrough
CT: control target
= control target key end

     0   :  { %11 = vsyncpa [#allocation3], 0  ;;  %s2322_s0 = inlined_call_operand.vmem [shape: f32[2,8,32], index: 0, kind: input, shape index: {}]   ;;  %s2323_s1 = inlined_call_operand.vmem [shape: f32[4,32,24], index: 1, kind: input, shape index: {}]   ;;  %s2324_s2 = inlined_call_operand.vmem [shape: f32[4,8,32], index: 2, kind: input, shape index: {}]   ;;  %s2325_s3 = inlined_call_operand.vmem [shape: f32[4,8,8], index: 3, kind: input, shape index: {}]   ;;  %s2326_s4 = inlined_call_operand.vmem [shape: f32[8,8], index: 4, kind: input, shape index: {}]   ;;  %s2327_s5 = inlined_call_operand.vmem [shape: f32[1,32], index: 5, kind: input, shape index: {}]   ;;  %s2328_s6 = inlined_call_operand.hbm [shape: f32[2,8,32], index: 6, kind: output, shape index: {}]  }
   0x1   :  { %13 = vsyncpa [#allocation3 + $0x1], 0  ;;  %s2035_s21 = smov 0   ;;  %s2037_s22 = smov 0  }
   0x2   :  { %s2039_s23 = smov 0   ;;  %s2041_s24 = smov 0  }
   0x3 LB: > { %s2056_s25 = sadd.s32 4294967295, %s1991_s24   ;;  %s1662_s26 = sadd.s32 4294967294, %s1991_s24   ;;  %s1991_s24 = sphi %s2041_s24, %s2334_s24   ;;  %s1987_s23 = sphi %s2039_s23, %s2333_s23   ;;  %s1983_s22 = sphi %s2037_s22, %s2332_s22   ;;  %s1979_s21 = sphi %s2035_s21, %s2331_s21  }
   0x4   : > { %s2060_s27 = sadd.s32 1, %s1991_s24   ;;  %s157_s28 = sadd.s32 1, %s1987_s23 }
   0x5   : > { %s154_s29 = ssub.s32 %s1991_s24, %s2060_s27  ;;  %p167_p0 = scmp.ne.s32.totalorder %s1987_s23, %s1983_s22 }
   0x6   : > { %p155_p1 = scmp.eq.s32.totalorder %s154_s29, 0  ;;  %p168_p2 = scmp.eq.s32.totalorder %s2056_s25, 1 }
   0x7   : > { %p173_p3 = scmp.ne.s32.totalorder %s1983_s22, %s1979_s21  ;;  %p174_p4 = scmp.eq.s32.totalorder %s1662_s26, 1 }
   0x8   : > { %s2071_s30 = scalar_select %p155_p1, %s1987_s23, %s157_s28  }
   0x9   : > { %p2073_p5 = por %p168_p2, %p167_p0  ;;  %p2077_p6 = por %p174_p4, %p173_p3 }
   0xa   : > { %p1665_p7 = scmp.ge.s32.totalorder %s1991_s24, 1  ;;  %p214_p8 = scmp.lt.s32.totalorder %s1991_s24, 3 }
   0xc   : > { %p215_p9 = pnand %p1665_p7, %p214_p8 }
   0xd   : > { %v248_v0 = vld [vmem:[%s2323_s1] sm:$0xff] (!%p215_p9)  ;;  %v249_v1 = vld [vmem:[%s2323_s1 + $0x8] sm:$0xff] (!%p215_p9)  ;;  %v1993_v3 = vmov (!%p215_p9), 0.0|0.0   ;;  %v250_v6 = vld [vmem:[%s2323_s1 + $0x10] sm:$0xff] (!%p215_p9)  ;;  %p243_p10 = scmp.lt.s32.totalorder (!%p215_p9), %s2056_s25, 1  ;;  %vm1994_vm0 = vmmov (!%p215_p9), 0  }
   0xe   : > { %218 = sbr.rel (%p215_p9) target bundleno = 1344 (0x540), region = 44  ;;  %v252_v2 = vld [vmem:[%s2323_s1 + $0x20] sm:$0xff] (!%p215_p9)  ;;  %1844 = vmatprep.subr.bf16.mxu0 (!%p215_p9), %v1993_v3  ;;  %1850 = vmatprep.subr.bf16.mxu1 (!%p215_p9), %v1993_v3  ;;  %v1845_v4 = vpack.c.bf16 (!%p215_p9), %v249_v1, %v248_v0  ;;  %v253_v5 = vld [vmem:[%s2323_s1 + $0x28] sm:$0xff] (!%p215_p9)  ;;  %v251_v7 = vld [vmem:[%s2323_s1 + $0x18] sm:$0xff] (!%p215_p9)  ;;  %v1995_v11 = vmov (!%p215_p9), 0.0   ;;  %s1996_s11 = smov (!%p215_p9), 8  }
   0xf   : > { %v1851_v8 = vpack.c.bf16 (!%p215_p9), %v253_v5, %v252_v2  ;;  %v254_v9 = vld [vmem:[%s2323_s1 + $0x30] sm:$0xff] (!%p215_p9)  ;;  %v255_v10 = vld [vmem:[%s2323_s1 + $0x38] sm:$0xff] (!%p215_p9)  ;;  %1748 = vmatprep.mubr.msk.f32.mxu0 (!%p215_p9), %vm1994_vm0, %v1995_v11  ;;  %1759 = vmatprep.mubr.msk.f32.mxu1 (!%p215_p9), %vm1994_vm0, %v1995_v11  ;;  %v1848_v12 = vpack.c.bf16 (!%p215_p9), %v251_v7, %v250_v6  ;;  %v256_v14 = vld [vmem:[%s2323_s1 + $0x40] sm:$0xff] (!%p215_p9)  ;;  %vm264_vm1 = vcmask (!%p215_p9), 261120   ;;  %s1997_s26 = smov (!%p215_p9), 120   ;;  %vm620_vm2 = vcmask (!%p215_p9), 64512  }
  0x10   : > { %1846 = vmatpush3.bf16.msra.mxu0 (!%p215_p9), %v1845_v4  ;;  %v1854_v13 = vpack.c.bf16 (!%p215_p9), %v255_v10, %v254_v9  ;;  %v257_v15 = vld [vmem:[%s2323_s1 + $0x48] sm:$0xff] (!%p215_p9)  ;;  %v260_v16 = vld [vmem:[%s2323_s1 + $0x60] sm:$0xff] (!%p215_p9)  ;;  %v1674_v21 = vld [vmem:[%s2325_s3 + $0x18] sm:$0xff] (!%p215_p9)  ;;  %s1998_s13 = smov (!%p215_p9), 112   ;;  %s240_s28 = sand.u32 (!%p215_p9), 1, %s1983_s22  }
  0x11   : > { %1852 = vmatpush3.bf16.msra.mxu1 (!%p215_p9), %v1851_v8  ;;  %1847 = vmatprep.subr.bf16.mxu0 (!%p215_p9), %v1993_v3  ;;  %v261_v17 = vld [vmem:[%s2323_s1 + $0x68] sm:$0xff] (!%p215_p9)  ;;  %v1857_v20 = vpack.c.bf16 (!%p215_p9), %v257_v15, %v256_v14  ;;  %v258_v23 = vld [vmem:[%s2323_s1 + $0x50] sm:$0xff] (!%p215_p9)  ;;  %v259_v24 = vld [vmem:[%s2323_s1 + $0x58] sm:$0xff] (!%p215_p9)  ;;  %s1666_s29 = sshll.u32 (!%p215_p9), %s240_s28, 3 }
  0x12   : > { %1853 = vmatprep.subr.bf16.mxu1 (!%p215_p9), %v1993_v3  ;;  %v1672_v18 = vld [vmem:[%s2325_s3 + $0x8] sm:$0xff] (!%p215_p9)  ;;  %v1863_v22 = vpack.c.bf16 (!%p215_p9), %v261_v17, %v260_v16  ;;  %v262_v25 = vld [vmem:[%s2323_s1 + $0x70] sm:$0xff] (!%p215_p9)  ;;  %v263_v26 = vld [vmem:[%s2323_s1 + $0x78] sm:$0xff] (!%p215_p9)  ;;  %v1860_v27 = vpack.c.bf16 (!%p215_p9), %v259_v24, %v258_v23  ;;  %s242_s12 = scalar_lea.vmem (!%p215_p9), [#allocation2], %s1666_s29 }
  0x13   : > { %556 = vrot.lane.b32.xlu0 (!%p215_p9), %v1672_v18, %s1996_s11  ;;  %v1866_v28 = vpack.c.bf16 (!%p215_p9), %v263_v26, %v262_v25  ;;  %v548_v47 = vld [vmem:[%s2325_s3] sm:$0xff] (!%p215_p9)  ;;  %v1673_v48 = vld [vmem:[%s2325_s3 + $0x10] sm:$0xff] (!%p215_p9) }
  0x14   : > { %1849 = vmatpush3.bf16.msra.mxu0 (!%p215_p9), %v1848_v12  ;;  %v619_v9 = vld [vmem:[%s2326_s4] sm:$0xff] (!%p215_p9) }
  0x15   : > { %s244_s10 = scalar_select %p243_p10, %s2056_s25, 1  ;;  %1855 = vmatpush3.bf16.msra.mxu1 %v1854_v13  ;;  %1856 = vmatprep.subr.bf16.mxu0 %v1993_v3 }
  0x16   : > { %1862 = vmatprep.subr.bf16.mxu1 %v1993_v3 }
  0x17   : > { %s1667_s15 = sshll.u32 %s244_s10, 3  ;;  %592 = vrot.lane.b32.xlu0 %v1674_v21, %s1996_s11  ;;  %s1693_s10 = sshll.u32 %s2056_s25, 7 }
  0x18   : > { %s246_s9 = scalar_lea.vmem %s2322_s0, %s1667_s15  ;;  %s2279_s17 = scalar_lea.hbm %s2328_s6, %s1693_s10 }
  0x19   : > { %v247_v19 = vld [vmem:[%s246_s9] sm:$0xff]  ;;  %s1590_s15 = scalar_lea.sflag [#allocation3], %s240_s28  ;;  %s1999_s25 = smov [#allocation2]  }
  0x1a   : > { %1749 = vmatmul.mubr.msk.f32.vlgmr.msra.gmra.mrb[0].mxu0 %vm264_vm1, %v247_v19  ;;  %1760 = vmatmul.mubr.msk.f32.vlgmr.msra.gmra.mrb[0].mxu1 %vm264_vm1, %v247_v19  ;;  %s1933_s19 = sshll.u32 %s1999_s25, 4  ;;  %s1934_s19 = int_to_ptr.vmem [resolvable:$false] %s1933_s19 }
  0x1b   : > { %1858 = vmatpush3.bf16.msra.mxu0 %v1857_v20  ;;  %1864 = vmatpush3.bf16.msra.mxu1 %v1863_v22  ;;  %s1935_s20 = scalar_lea.vmem %s1934_s19, 256 }
  0x1c   : > { %1859 = vmatprep.subr.bf16.mxu0 %v1993_v3  ;;  %1865 = vmatprep.subr.bf16.mxu1 %v1993_v3 }
  0x1d   : > { %1770 = vmatprep.mubr.msk.f32.mxu0 %vm1994_vm0, %v1995_v11  ;;  %1781 = vmatprep.mubr.msk.f32.mxu1 %vm1994_vm0, %v1995_v11 }
  0x1f   : > { %1861 = vmatpush3.bf16.msra.mxu0 %v1860_v27  ;;  %1867 = vmatpush3.bf16.msra.mxu1 %v1866_v28 }
  0x20   : > { %1784 = vmatprep.subr.mxu0 %v1995_v11  ;;  %1789 = vmatprep.subr.mxu1 %v1995_v11 }
  0x22   : > { %1771 = vmatmul.mubr.msk.f32.vlgmr.msra.gmra.mrb[2].mxu0 %vm264_vm1, %v247_v19  ;;  %1782 = vmatmul.mubr.msk.f32.vlgmr.msra.gmra.mrb[2].mxu1 %vm264_vm1, %v247_v19 }
  0x23   : > { %1786 = vmatprep.mubr.msk.f32.mxu0 %vm1994_vm0, %v1995_v11  ;;  %1791 = vmatprep.mubr.msk.f32.mxu1 %vm1994_vm0, %v1995_v11 }
  0x85   : > { %v557_v29 = vpop.permute.xlu0 %556 }
  0x89   : > { %v593_v30 = vpop.permute.xlu0 %592 }
  0xed   : > { %v2160_v31 = vpop.f32.mrb[0].mxu0  ;;  %v2162_v32 = vpop.f32.mrb[0].mxu1 }
  0xee   : > { %v1750_v33 = vpop.f32.mrb[1].mxu0  ;;  %v595_v34 = vmul.f32 %v593_v30, %v2160_v31  ;;  %v559_v35 = vmul.f32 %v557_v29, %v2160_v31  ;;  %v1761_v36 = vpop.f32.mrb[1].mxu1  ;;  %v596_v37 = vmul.f32 %v593_v30, %v2162_v32  ;;  %v560_v38 = vmul.f32 %v557_v29, %v2162_v32 }
  0xef   : > { %v549_v49 = vmul.f32 %v548_v47, %v2160_v31  ;;  %v585_v53 = vmul.f32 %v1673_v48, %v2160_v31  ;;  %v550_v54 = vmul.f32 %v548_v47, %v2162_v32  ;;  %v586_v59 = vmul.f32 %v1673_v48, %v2162_v32 }
  0xf0   : > { %603 = vrot.lane.b32.xlu0 %v595_v34, %s1997_s26  ;;  %567 = vrot.lane.b32.xlu1 %v559_v35, %s1997_s26 }
  0xf4   : > { %605 = vrot.lane.b32.xlu0 %v596_v37, %s1997_s26  ;;  %569 = vrot.lane.b32.xlu1 %v560_v38, %s1997_s26 }
  0xf5   : > { %v2168_v39 = vpop.f32.mrb[2].mxu0  ;;  %v2170_v40 = vpop.f32.mrb[2].mxu1 }
  0xf6   : > { %v1772_v41 = vpop.f32.mrb[3].mxu0  ;;  %v597_v42 = vmul.f32 %v593_v30, %v2168_v39  ;;  %v561_v43 = vmul.f32 %v557_v29, %v2168_v39  ;;  %v1783_v44 = vpop.f32.mrb[3].mxu1  ;;  %v562_v45 = vmul.f32 %v557_v29, %v2170_v40  ;;  %v598_v46 = vmul.f32 %v593_v30, %v2170_v40 }
  0xf7   : > { %v551_v60 = vmul.f32 %v548_v47, %v2168_v39  ;;  %v587_v1 = vmul.f32 %v1673_v48, %v2168_v39  ;;  %v552_v2 = vmul.f32 %v548_v47, %v2170_v40  ;;  %v588_v6 = vmul.f32 %v1673_v48, %v2170_v40 }
  0xf8   : > { %607 = vrot.lane.b32.xlu0 %v597_v42, %s1997_s26  ;;  %571 = vrot.lane.b32.xlu1 %v561_v43, %s1997_s26 }
  0xfc   : > { %573 = vrot.lane.b32.xlu1 %v562_v45, %s1997_s26 }
 0x100   : > { %609 = vrot.lane.b32.xlu1 %v598_v46, %s1997_s26 }
 0x162   : > { %v604_v50 = vpop.permute.xlu0 %603  ;;  %v568_v51 = vpop.permute.xlu1 %567 }
 0x163   : > { %v579_v52 = vadd.f32 %v568_v51, %v549_v49  ;;  %v615_v55 = vadd.f32 %v604_v50, %v585_v53 }
 0x165   : > { %1785 = vmatpush3.xpose.msk.msra.mxu0 %vm620_vm2, %v579_v52 }
 0x166   : > { %v606_v56 = vpop.permute.xlu0 %605  ;;  %v570_v57 = vpop.permute.xlu1 %569  ;;  %1794 = vmatprep.subr.mxu0 %v1995_v11 }
 0x167   : > { %v580_v58 = vadd.f32 %v570_v57, %v550_v54  ;;  %v616_v61 = vadd.f32 %v606_v56, %v586_v59 }
 0x168   : > { %1787 = vmatmul.mubr.msk.f32.vlgmr.msra.gmra.mrb[4].mxu0 %vm620_vm2, %v615_v55 }
 0x169   : > { %1790 = vmatpush3.xpose.msk.msra.mxu1 %vm620_vm2, %v580_v58  ;;  %1796 = vmatprep.mubr.msk.f32.mxu0 %vm1994_vm0, %v1995_v11 }
 0x16a   : > { %v572_v62 = vpop.permute.xlu1 %571  ;;  %1799 = vmatprep.subr.mxu1 %v1995_v11  ;;  %v608_v63 = vpop.permute.xlu0 %607 }
 0x16b   : > { %v581_v0 = vadd.f32 %v572_v62, %v551_v60  ;;  %v617_v3 = vadd.f32 %v608_v63, %v587_v1  ;;  %v1277_v63 = vld [vmem:[%s2324_s2] sm:$0xff]  ;;  %v1279_v1 = vld [vmem:[%s2324_s2 + $0x10] sm:$0xff] }
 0x16c   : > { %1792 = vmatmul.mubr.msk.f32.vlgmr.msra.gmra.mrb[4].mxu1 %vm620_vm2, %v616_v61 }
 0x16d   : > { %1795 = vmatpush3.xpose.msk.msra.mxu0 %vm620_vm2, %v581_v0  ;;  %1801 = vmatprep.mubr.msk.f32.mxu1 %vm1994_vm0, %v1995_v11  ;;  %v1278_v0 = vld [vmem:[%s2324_s2 + $0x8] sm:$0xff] }
 0x16e   : > { %v574_v4 = vpop.permute.xlu1 %573  ;;  %1804 = vmatprep.subr.mxu0 %v1995_v11 }
 0x16f   : > { %v582_v5 = vadd.f32 %v574_v4, %v552_v2  ;;  %v1280_v4 = vld [vmem:[%s2324_s2 + $0x18] sm:$0xff] }
 0x170   : > { %1797 = vmatmul.mubr.msk.f32.vlgmr.msra.gmra.mrb[6].mxu0 %vm620_vm2, %v617_v3 }
 0x171   : > { %1800 = vmatpush3.xpose.msk.msra.mxu1 %vm620_vm2, %v582_v5  ;;  %1806 = vmatprep.mubr.msk.f32.mxu0 %vm1994_vm0, %v1995_v11 }
 0x172   : > { %v610_v7 = vpop.permute.xlu1 %609  ;;  %1809 = vmatprep.subr.mxu1 %v1995_v11 }
 0x173   : > { %v618_v8 = vadd.f32 %v610_v7, %v588_v6 }
 0x175   : > { %1802 = vmatmul.mubr.msk.f32.vlgmr.msra.gmra.mrb[6].mxu1 %vm620_vm2, %v618_v8 }
 0x176   : > { %1811 = vmatprep.mubr.msk.f32.mxu1 %vm1994_vm0, %v1995_v11 }
 0x23b   : > { %v693_v10 = vpop.f32.mrb[4].mxu0 }
 0x23c   : > { %v694_v12 = vadd.f32 %v693_v10, %v619_v9  ;;  %v1788_v13 = vpop.f32.mrb[5].mxu0 }
 0x23e   : > { %v925_v14 = vsel %vm620_vm2, %v694_v12, -inf }
 0x23f   : > { %v769_v15 = vpop.f32.mrb[4].mxu1  ;;  %926 = vmax.xlane.f32.xlu0 %v925_v14 }
 0x240   : > { %v770_v16 = vadd.f32 %v769_v15, %v619_v9  ;;  %v1793_v17 = vpop.f32.mrb[5].mxu1 }
 0x242   : > { %v928_v18 = vsel %vm620_vm2, %v770_v16, -inf }
 0x243   : > { %929 = vmax.xlane.f32.xlu1 %v928_v18  ;;  %v845_v19 = vpop.f32.mrb[6].mxu0 }
 0x244   : > { %v846_v20 = vadd.f32 %v845_v19, %v619_v9  ;;  %v1798_v21 = vpop.f32.mrb[7].mxu0 }
 0x246   : > { %v931_v22 = vsel %vm620_vm2, %v846_v20, -inf }
 0x247   : > { %932 = vmax.xlane.f32.xlu0 %v931_v22 }
 0x248   : > { %v921_v23 = vpop.f32.mrb[6].mxu1 }
 0x249   : > { %v922_v24 = vadd.f32 %v921_v23, %v619_v9  ;;  %v1803_v25 = vpop.f32.mrb[7].mxu1 }
 0x24b   : > { %v934_v26 = vsel %vm620_vm2, %v922_v24, -inf }
 0x24c   : > { %935 = vmax.xlane.f32.xlu0 %v934_v26 }
 0x254   : > { %970 = vrot.lane.b32.xlu1 %v2160_v31, %s1998_s13 }
 0x2cc   : > { %v927_v27 = vpop.xlane.xlu0 %926 }
 0x2cd   : > { %v937_v28 = vsub.f32 %v694_v12, %v927_v27 }
 0x2cf   : > { %v941_v29 = vmul.f32 1.442695, %v937_v28 }
 0x2d0   : > { %v930_v30 = vpop.xlane.xlu1 %929 }
 0x2d1   : > { %1913 = vpow2.f32 %v941_v29  ;;  %v938_v33 = vsub.f32 %v770_v16, %v930_v30 }
 0x2d3   : > { %v943_v34 = vmul.f32 1.442695, %v938_v33 }
 0x2d4   : > { %v971_v35 = vpop.permute.xlu1 %970  ;;  %v933_v36 = vpop.xlane.xlu0 %932 }
 0x2d5   : > { %1915 = vpow2.f32 %v943_v34  ;;  %v939_v37 = vsub.f32 %v846_v20, %v933_v36  ;;  %1805 = vmatpush3.msra.mxu0 %v971_v35 }
 0x2d6   : > { %1814 = vmatprep.subr.mxu0 %v1995_v11 }
 0x2d7   : > { %v945_v38 = vmul.f32 1.442695, %v939_v37 }
 0x2d9   : > { %1917 = vpow2.f32 %v945_v38  ;;  %v936_v41 = vpop.xlane.xlu0 %935 }
 0x2da   : > { %v940_v42 = vsub.f32 %v922_v24, %v936_v41  ;;  %v1691_v24 = vld [vmem:[%s2327_s5] ss:$0 sm:$0xff] }
 0x2db   : > { %v1914_v43 = vpop.eup %1913 }
 0x2dc   : > { %v947_v31 = vmul.f32 1.442695, %v940_v42  ;;  %v949_v44 = vsel %vm620_vm2, %v1914_v43, 0.0 }
 0x2dd   : > { %950 = vadd.xlane.f32.xlu1 %v949_v44 }
 0x2de   : > { %1919 = vpow2.f32 %v947_v31 }
 0x2df   : > { %v1916_v45 = vpop.eup %1915 }
 0x2e0   : > { %v952_v46 = vsel %vm620_vm2, %v1916_v45, 0.0 }
 0x2e1   : > { %953 = vadd.xlane.f32.xlu0 %v952_v46 }
 0x2e3   : > { %v1918_v47 = vpop.eup %1917 }
 0x2e4   : > { %v955_v48 = vsel %vm620_vm2, %v1918_v47, 0.0 }
 0x2e5   : > { %956 = vadd.xlane.f32.xlu1 %v955_v48 }
 0x2e8   : > { %v1920_v49 = vpop.eup %1919 }
 0x2e9   : > { %v958_v50 = vsel %vm620_vm2, %v1920_v49, 0.0 }
 0x2ea   : > { %959 = vadd.xlane.f32.xlu0 %v958_v50 }
 0x2f6   : > { %1124 = vrot.lane.b32.xlu1 %v2168_v39, %s1998_s13 }
 0x2fa   : > { %1201 = vrot.lane.b32.xlu1 %v2170_v40, %s1998_s13 }
 0x300   : > { %1047 = vrot.lane.b32.xlu0 %v2162_v32, %s1998_s13  ;;  %s1603_s13 = sshll.u32 %s242_s12, 4  ;;  %s2281_s13 = int_to_ptr.vmem [resolvable:$true] %s1603_s13 }
 0x301   : > { %s1929_s18 = scalar_lea.vmem %s2281_s13, 128  ;;  %p1936_p0 = scmp.lt.s32.totalorder %s2281_s13, %s1934_s19 }
 0x302   : > { %p1930_p11 = scmp.ne.s32.totalorder %s2281_s13, %s1929_s18  ;;  %p1937_p1 = scmp.lt.s32.totalorder %s1935_s20, %s1929_s18 }
 0x304   : > { %p1931_p12 = pnand %p1930_p11, %p2073_p5  ;;  %p1938_p2 = por %p1937_p1, %p1936_p0 }
 0x306   : > { %p1932_p13 = pneg %p1931_p12 }
 0x308   : > { %p1939_p3 = pnand %p1938_p2, %p1932_p13 }
 0x36a   : > { %v951_v51 = vpop.xlane.xlu1 %950 }
 0x36b   : > { %1921 = vrcp.f32 %v951_v51 }
 0x36e   : > { %v954_v52 = vpop.xlane.xlu0 %953 }
 0x36f   : > { %1923 = vrcp.f32 %v954_v52 }
 0x372   : > { %v957_v53 = vpop.xlane.xlu1 %956 }
 0x373   : > { %1925 = vrcp.f32 %v957_v53 }
 0x375   : > { %v1922_v54 = vpop.eup %1921 }
 0x376   : > { %v965_v55 = vmul.f32 %v1922_v54, %v1914_v43  ;;  %v1125_v56 = vpop.permute.xlu1 %1124 }
 0x377   : > { %v960_v57 = vpop.xlane.xlu0 %959 }
 0x378   : > { %1927 = vrcp.f32 %v960_v57  ;;  %1807 = vmatmul.mubr.msk.f32.vlgmr.msra.gmra.mrb[8].mxu0 %vm620_vm2, %v965_v55 }
 0x379   : > { %v1924_v39 = vpop.eup %1923  ;;  %1815 = vmatpush3.msra.mxu0 %v1125_v56  ;;  %1816 = vmatprep.mubr.msk.f32.mxu0 %vm1994_vm0, %v1995_v11 }
 0x37a   : > { %v966_v40 = vmul.f32 %v1924_v39, %v1916_v45  ;;  %1824 = vmatprep.subr.mxu0 %v1995_v11  ;;  %v1202_v59 = vpop.permute.xlu1 %1201 }
 0x37b   : > { %v1048_v32 = vpop.permute.xlu0 %1047 }
 0x37c   : > { %1810 = vmatpush3.msra.mxu1 %v1048_v32 }
 0x37d   : > { %v1926_v58 = vpop.eup %1925  ;;  %1812 = vmatmul.mubr.msk.f32.vlgmr.msra.gmra.mrb[8].mxu1 %vm620_vm2, %v966_v40  ;;  %1819 = vmatprep.subr.mxu1 %v1995_v11 }
 0x37e   : > { %v967_v60 = vmul.f32 %v1926_v58, %v1918_v47  ;;  %1820 = vmatpush3.msra.mxu1 %v1202_v59  ;;  %1821 = vmatprep.mubr.msk.f32.mxu1 %vm1994_vm0, %v1995_v11 }
 0x37f   : > { %1829 = vmatprep.subr.mxu1 %v1995_v11 }
 0x380   : > { %1817 = vmatmul.mubr.msk.f32.vlgmr.msra.gmra.mrb[10].mxu0 %vm620_vm2, %v967_v60 }
 0x381   : > { %1826 = vmatprep.mubr.msk.f32.mxu0 %vm1994_vm0, %v1995_v11  ;;  %1825 = vmatpush3.msra.mxu0 %v1277_v63 }
 0x382   : > { %v1928_v61 = vpop.eup %1927  ;;  %1834 = vmatprep.subr.mxu0 %v1995_v11 }
 0x383   : > { %v968_v62 = vmul.f32 %v1928_v61, %v1920_v49 }
 0x385   : > { %1822 = vmatmul.mubr.msk.f32.vlgmr.msra.gmra.mrb[10].mxu1 %vm620_vm2, %v968_v62 }
 0x386   : > { %1831 = vmatprep.mubr.msk.f32.mxu1 %vm1994_vm0, %v1995_v11  ;;  %1830 = vmatpush3.msra.mxu1 %v1278_v0 }
 0x387   : > { %1839 = vmatprep.subr.mxu1 %v1995_v11 }
 0x44b   : > { %v1042_v2 = vpop.f32.mrb[8].mxu0 }
 0x44c   : > { %v1808_v3 = vpop.f32.mrb[9].mxu0  ;;  %1827 = vmatmul.mubr.msk.f32.vlgmr.msra.gmra.mrb[12].mxu0 %vm620_vm2, %v1042_v2 }
 0x44d   : > { %1835 = vmatpush3.msra.mxu0 %v1279_v1  ;;  %1836 = vmatprep.mubr.msk.f32.mxu0 %vm1994_vm0, %v1995_v11 }
 0x450   : > { %v1119_v5 = vpop.f32.mrb[8].mxu1 }
 0x451   : > { %v1813_v6 = vpop.f32.mrb[9].mxu1  ;;  %1832 = vmatmul.mubr.msk.f32.vlgmr.msra.gmra.mrb[12].mxu1 %vm620_vm2, %v1119_v5 }
 0x452   : > { %1840 = vmatpush3.msra.mxu1 %v1280_v4  ;;  %1841 = vmatprep.mubr.msk.f32.mxu1 %vm1994_vm0, %v1995_v11 }
 0x453   : > { %v1196_v7 = vpop.f32.mrb[10].mxu0 }
 0x454   : > { %v1818_v8 = vpop.f32.mrb[11].mxu0  ;;  %1837 = vmatmul.mubr.msk.f32.vlgmr.msra.gmra.mrb[14].mxu0 %vm620_vm2, %v1196_v7 }
 0x458   : > { %v1273_v9 = vpop.f32.mrb[10].mxu1 }
 0x459   : > { %v1823_v10 = vpop.f32.mrb[11].mxu1  ;;  %1842 = vmatmul.mubr.msk.f32.vlgmr.msra.gmra.mrb[14].mxu1 %vm620_vm2, %v1273_v9 }
 0x51f   : > { %v1350_v12 = vpop.f32.mrb[12].mxu0 }
 0x520   : > { %v1828_v13 = vpop.f32.mrb[13].mxu0  ;;  %v1573_v15 = vsel %vm264_vm1, %v1350_v12, 0.0 }
 0x524   : > { %v1423_v14 = vpop.f32.mrb[12].mxu1 }
 0x525   : > { %v1574_v16 = vsel %vm264_vm1, %v1423_v14, 0.0  ;;  %v1833_v17 = vpop.f32.mrb[13].mxu1 }
 0x526   : > { %v1575_v18 = vadd.f32 %v1574_v16, %v1573_v15 }
 0x527   : > { %v1496_v11 = vpop.f32.mrb[14].mxu0 }
 0x528   : > { %v1576_v19 = vsel %vm264_vm1, %v1496_v11, 0.0  ;;  %v1838_v20 = vpop.f32.mrb[15].mxu0 }
 0x529   : > { %v1577_v21 = vadd.f32 %v1576_v19, %v1575_v18 }
 0x52c   : > { %v1569_v22 = vpop.f32.mrb[14].mxu1 }
 0x52d   : > { %v1578_v23 = vsel %vm264_vm1, %v1569_v22, 0.0  ;;  %v1843_v25 = vpop.f32.mrb[15].mxu1 }
 0x52e   : > { %v1579_v26 = vadd.f32 %v1578_v23, %v1577_v21 }
 0x530   : > { %v1587_v27 = vadd.f32 %v1691_v24, %v1579_v26 }
 0x532   : > { %1588 = vst.msk [vmem:[%s242_s12] sm:$0xff] %vm264_vm1, %v1587_v27 }
 0x533   : > { %1942 = shalt.err (!%p1939_p3)
}
 0x534   : > { %s1943_s26 = scalar_lea.hbm %s2279_s17, 128  ;;  %s1947_s9 = scalar_lea.hbm %s2328_s6, 256 }
 0x535   : > { %p1944_p4 = scmp.ne.s32.totalorder %s2279_s17, %s1943_s26  ;;  %p1948_p9 = scmp.lt.u32.totalorder %s2279_s17, %s2328_s6 }
 0x536   : > { %p1949_p10 = scmp.lt.u32.totalorder %s1947_s9, %s1943_s26  ;;  %p1951_p12 = scmp.lt.u32.totalorder %s1943_s26, %s2279_s17 }
 0x537   : > { %p1945_p7 = pnand %p1944_p4, %p2073_p5 }
 0x538   : > { %p1950_p11 = por %p1949_p10, %p1948_p9 }
 0x539   : > { %p1946_p8 = pneg %p1945_p7 }
 0x53a   : > { %p1952_p13 = por %p1951_p12, %p1950_p11 }
 0x53c   : > { %p1953_p0 = pnand %p1952_p13, %p1946_p8 }
 0x53e   : > { %1956 = shalt.err (!%p1953_p0)
}
 0x53f   : > { %1868 = dma.vmem_to_hbm [thread:$0]  (%p2073_p5), %s2281_s13, 128, %s2279_s17, %s1590_s15  }
 0x540 PF: > { %p1874_p1 = scmp.ge.s32.totalorder %s1991_s24, 2  ;;  %s1615_s12 = sand.u32 1, %s1979_s21  }
 0x541   : > { %s1616_s14 = scalar_lea.sflag [#allocation3], %s1615_s12 }
 0x542   : > { %p1871_p2 = pnand %p1874_p1, %p2077_p6 }
 0x544   : > { %1974 = dma.done.wait (!%p1871_p2), %s1616_s14, 128  }
 0x545   : > { %1976 = vsyncadd (!%p1871_p2), %s1616_s14, 4294967168  ;;  %p16_p3 = scmp.ge.s32.totalorder %s2060_s27, 4   ;;  %s2331_s21 = smov %s1983_s22 }
 0x546   : > { %s2332_s22 = smov %s1987_s23  ;;  %s2333_s23 = smov %s2071_s30 }
 0x547   : > { %s2334_s24 = smov %s2060_s27  ;;  %18 = sbr.rel (!%p16_p3) target bundleno = 3 (0x3), region = 82 }
 0x54e   :  { %1621 = vsyncpa [#allocation3], 1 }
 0x54f   :  { %1623 = vsyncpa [#allocation3 + $0x1], 1 }

</bundles_post_ra>
